<compile_context>
chip_gen: v7x
topology: tpu7x:2x2x1
jax: 0.10.0
libtpu: 0.0.40
codegen_flags: <defaults>
</compile_context>

<pallas_src>
import functools

import jax
import jax.numpy as jnp
import numpy as np
from jax.experimental import pallas as pl
from jax.experimental.pallas import tpu as pltpu


def resnet_block_kernel(xe_ref, xo_ref, msk_ref, p_ref, w1_ref, w2_ref, o_ref,
                        *, m_valid, eps=1e-5):
    """Lane-dense layout (C, M_pad): channels -> sublanes, flattened batch*length
    (zero-padded to a lane multiple) -> lanes.

    msk_ref rows: 0 = valid column, 1 = not-last-of-segment, 2 = not-first-of-segment.
    p_ref columns: [bn1_gamma, bn1_beta, conv1_bias, bn2_gamma, bn2_beta, conv2_bias].
    """
    c, m_pad = o_ref.shape

    xe = xe_ref[...]                          # x[..., 2j]    (C, Mp) f32
    xo = xo_ref[...]                          # x[..., 2j+1]  (C, Mp) f32
    msk = msk_ref[...]                        # (3, Mp) f32
    p = p_ref[...]                            # (C, 6)  f32

    # Hoist (1,Mp)->(C,Mp) broadcasts once and reuse (no CSE for broadcast_in_dim).
    valid_b = jnp.broadcast_to(msk[0:1, :], (c, m_pad))
    knl_b = jnp.broadcast_to(msk[1:2, :], (c, m_pad))    # zero at each segment's last slot / pad
    knf_b = jnp.broadcast_to(msk[2:3, :], (c, m_pad))    # zero at each segment's first slot / pad

    def shift_left(v):    # v[:, m] <- v[:, m+1]; 0 across segment/pad boundaries
        return pltpu.roll(v, m_pad - 1, axis=1) * knl_b

    def shift_right(v):   # v[:, m] <- v[:, m-1]; 0 across segment/pad boundaries
        return pltpu.roll(v, 1, axis=1) * knf_b

    # ---- shortcut = MaxPool1d(k=3, s=2)(ConstantPad1d((0,1), 0)(x)) ----
    # window j covers x[2j], x[2j+1], x[2j+2]; the last window's third tap is the
    # right zero-pad, supplied exactly by the masked shift (0 joins the max).
    # Pad columns stay exactly 0 (xe/xo pads are 0), keeping BN1 stats exact.
    shortcut = jnp.maximum(jnp.maximum(xe, xo), shift_left(xe))      # (C, Mp)

    inv_cnt = 1.0 / m_valid

    def bn_relu(h, gamma, beta):
        # Single-pass training-mode BN stats over the valid N*L_out columns (pad
        # columns of h are zero by construction), folded into scale/shift + ReLU.
        s1 = jnp.sum(h, axis=1, keepdims=True) * inv_cnt             # mean     (C,1)
        s2 = jnp.sum(h * h, axis=1, keepdims=True) * inv_cnt         # E[h^2]   (C,1)
        var = jnp.maximum(s2 - s1 * s1, 0.0)                         # biased var, clamped
        a = gamma * jax.lax.rsqrt(var + eps)
        b = beta - s1 * a
        return jnp.maximum(h * a + b, 0.0)

    # ---- Conv1d(C, C, k=3, padding=1): taps folded into one K=3C MXU contraction ----
    def conv3(h, w3, bias):
        taps = jnp.concatenate([shift_right(h), h, shift_left(h)], axis=0)   # (3C, Mp)
        out = jnp.dot(w3, taps.astype(jnp.bfloat16),
                      preferred_element_type=jnp.float32) + bias             # (C, Mp) f32
        return out * valid_b        # re-zero pad columns so the next BN stats stay exact

    g1, b1, cb1 = p[:, 0:1], p[:, 1:2], p[:, 2:3]
    g2, b2, cb2 = p[:, 3:4], p[:, 4:5], p[:, 5:6]

    h = bn_relu(shortcut, g1, b1)
    h = conv3(h, w1_ref[...], cb1)
    h = bn_relu(h, g2, b2)
    h = conv3(h, w2_ref[...], cb2)

    o_ref[...] = (h + shortcut).astype(o_ref.dtype)


@jax.jit
def resnet_block(x, params):
    """x: (N, C, L) float32 (L even); params = (g1, b1, w1, cb1, g2, b2, w2, cb2)
       with g/b/cb of shape (C,) and conv weights of shape (C, C, 3)."""
    g1, b1, w1, cb1, g2, b2, w2, cb2 = params
    n, c, l_in = x.shape
    assert l_in % 2 == 0, "kernel assumes even input length (test uses L=16)"
    l_out = l_in // 2                     # == (L - 2) // 2 + 1 for the pad(0,1)+k3s2 pool
    m_valid = n * l_out
    m_pad = max(128, ((m_valid + 127) // 128) * 128)   # lane-dense last axis

    # Wrapper-side layout plumbing (pure XLA): even/odd de-interleave + zero lane-pad.
    xt = jnp.transpose(x, (1, 0, 2)).astype(jnp.float32)              # (C, N, L)
    xe = jnp.pad(xt[:, :, 0::2].reshape(c, m_valid), ((0, 0), (0, m_pad - m_valid)))
    xo = jnp.pad(xt[:, :, 1::2].reshape(c, m_valid), ((0, 0), (0, m_pad - m_valid)))

    # Packed masks: valid / not-last-of-segment / not-first-of-segment (one DMA).
    jpos = np.arange(m_pad)
    col = jpos % l_out
    is_valid = jpos < m_valid
    masks = jnp.asarray(np.stack([
        is_valid.astype(np.float32),
        (is_valid & (col != l_out - 1)).astype(np.float32),
        (is_valid & (col != 0)).astype(np.float32),
    ], axis=0))                                                       # (3, Mp)

    # Packed per-channel params (one DMA); conv taps folded into K -> bf16 weights.
    pvec = jnp.stack([g1, b1, cb1, g2, b2, cb2], axis=1).astype(jnp.float32)      # (C, 6)
    w1m = jnp.transpose(w1, (0, 2, 1)).reshape(c, 3 * c).astype(jnp.bfloat16)     # (C, 3C)
    w2m = jnp.transpose(w2, (0, 2, 1)).reshape(c, 3 * c).astype(jnp.bfloat16)     # (C, 3C)

    # Size-derived VMEM budget (operands + intermediates, 4x headroom, <= 64 MiB for v7x).
    est_bytes = (10 * c + 6) * m_pad * 4 + 2 * (3 * c * c) * 2 + c * 6 * 4
    vmem_limit = int(min(max(4 * est_bytes, 4 * 1024 * 1024), 64 * 1024 * 1024))

    kernel = functools.partial(resnet_block_kernel, m_valid=m_valid)
    vmem = pl.BlockSpec(memory_space=pltpu.MemorySpace.VMEM)
    out_flat = pl.pallas_call(
        kernel,
        out_shape=jax.ShapeDtypeStruct((c, m_pad), jnp.float32),
        in_specs=[vmem] * 6,
        out_specs=vmem,
        compiler_params=pltpu.CompilerParams(vmem_limit_bytes=vmem_limit),
    )(xe, xo, masks, pvec, w1m, w2m)

    out = out_flat[:, :m_valid].reshape(c, n, l_out)
    return jnp.transpose(out, (1, 0, 2)).astype(x.dtype)              # (N, C, L_out)


def ref_forward(x, params):
    """Pure-JAX reference with identical semantics (for validation)."""
    g1, b1, w1, cb1, g2, b2, w2, cb2 = params

    def bc(v):
        return v.reshape(1, -1, 1)

    xp = jnp.pad(x, ((0, 0), (0, 0), (0, 1)))
    sc = jax.lax.reduce_window(xp, -jnp.inf, jax.lax.max,
                               window_dimensions=(1, 1, 3),
                               window_strides=(1, 1, 2), padding='VALID')

    def bn_relu(h, g, b):
        mean = jnp.mean(h, axis=(0, 2), keepdims=True)
        var = jnp.mean((h - mean) ** 2, axis=(0, 2), keepdims=True)
        return jnp.maximum((h - mean) / jnp.sqrt(var + 1e-5) * bc(g) + bc(b), 0.0)

    def conv(h, w, b):
        out = jax.lax.conv_general_dilated(h, w, window_strides=(1,),
                                           padding=((1, 1),),
                                           dimension_numbers=('NCH', 'OIH', 'NCH'),
                                           precision=jax.lax.Precision.HIGHEST)
        return out + bc(b)

    h = bn_relu(sc, g1, b1)
    h = conv(h, w1, cb1)
    h = bn_relu(h, g2, b2)
    h = conv(h, w2, cb2)
    return h + sc


if __name__ == "__main__":
    N, C, L = 2, 8, 16                               # batch, channel_size, sequence length

    key = jax.random.PRNGKey(0)
    ks = jax.random.split(key, 9)
    x = jax.random.normal(ks[0], (N, C, L), jnp.float32)

    # Deterministic parameter init (shapes follow the PyTorch module's __init__).
    g1 = (1.0 + 0.1 * jax.random.normal(ks[1], (C,))).astype(jnp.float32)    # BN1 gamma
    b1 = (0.1 * jax.random.normal(ks[2], (C,))).astype(jnp.float32)          # BN1 beta
    w1 = (jax.random.normal(ks[3], (C, C, 3)) / jnp.sqrt(3.0 * C)).astype(jnp.float32)
    cb1 = (0.1 * jax.random.normal(ks[4], (C,))).astype(jnp.float32)         # conv1 bias
    g2 = (1.0 + 0.1 * jax.random.normal(ks[5], (C,))).astype(jnp.float32)    # BN2 gamma
    b2 = (0.1 * jax.random.normal(ks[6], (C,))).astype(jnp.float32)          # BN2 beta
    w2 = (jax.random.normal(ks[7], (C, C, 3)) / jnp.sqrt(3.0 * C)).astype(jnp.float32)
    cb2 = (0.1 * jax.random.normal(ks[8], (C,))).astype(jnp.float32)         # conv2 bias

    params = (g1, b1, w1, cb1, g2, b2, w2, cb2)

    out = jax.block_until_ready(resnet_block(x, params))
    ref = jax.block_until_ready(ref_forward(x, params))

    # bf16 MXU path for the conv dots (f32 accumulate); 1e-2 tolerance absorbs it.
    np.testing.assert_allclose(np.asarray(out), np.asarray(ref), rtol=1e-2, atol=1e-2)
    print("KERNEL_OK")
</pallas_src>

<mosaic_0001>
module attributes {stable_mosaic.version = 11 : i64} {
  func.func @resnet_block_kernel(%arg0: memref<8x128xf32, #tpu.memory_space<vmem>>, %arg1: memref<8x128xf32, #tpu.memory_space<vmem>>, %arg2: memref<3x128xf32, #tpu.memory_space<vmem>>, %arg3: memref<8x6xf32, #tpu.memory_space<vmem>>, %arg4: memref<8x24xbf16, #tpu.memory_space<vmem>>, %arg5: memref<8x24xbf16, #tpu.memory_space<vmem>>, %arg6: memref<8x128xf32, #tpu.memory_space<vmem>>) attributes {dimension_semantics = [], scalar_prefetch = 0 : i64, scratch_operands = 0 : i64, tpu.core_type = #tpu.core_type<tc>} {
    %c0 = arith.constant 0 : index
    %c0_0 = arith.constant 0 : index
    %0 = vector.load %arg0[%c0, %c0_0] : memref<8x128xf32, #tpu.memory_space<vmem>>, vector<8x128xf32>
    %c0_1 = arith.constant 0 : index
    %c0_2 = arith.constant 0 : index
    %1 = vector.load %arg1[%c0_1, %c0_2] : memref<8x128xf32, #tpu.memory_space<vmem>>, vector<8x128xf32>
    %c0_3 = arith.constant 0 : index
    %c0_4 = arith.constant 0 : index
    %2 = vector.load %arg2[%c0_3, %c0_4] : memref<3x128xf32, #tpu.memory_space<vmem>>, vector<3x128xf32>
    %c0_5 = arith.constant 0 : index
    %c0_6 = arith.constant 0 : index
    %3 = vector.load %arg3[%c0_5, %c0_6] : memref<8x6xf32, #tpu.memory_space<vmem>>, vector<8x6xf32>
    %4 = vector.extract_strided_slice %2 {offsets = [0, 0], sizes = [1, 128], strides = [1, 1]} : vector<3x128xf32> to vector<1x128xf32>
    %5 = vector.shape_cast %4 : vector<1x128xf32> to vector<1x128xf32>
    %6 = vector.broadcast %5 : vector<1x128xf32> to vector<8x128xf32>
    %7 = vector.extract_strided_slice %2 {offsets = [1, 0], sizes = [1, 128], strides = [1, 1]} : vector<3x128xf32> to vector<1x128xf32>
    %8 = vector.shape_cast %7 : vector<1x128xf32> to vector<1x128xf32>
    %9 = vector.broadcast %8 : vector<1x128xf32> to vector<8x128xf32>
    %10 = vector.extract_strided_slice %2 {offsets = [2, 0], sizes = [1, 128], strides = [1, 1]} : vector<3x128xf32> to vector<1x128xf32>
    %11 = vector.shape_cast %10 : vector<1x128xf32> to vector<1x128xf32>
    %12 = vector.broadcast %11 : vector<1x128xf32> to vector<8x128xf32>
    %13 = arith.maximumf %0, %1 : vector<8x128xf32>
    %c127_i32 = arith.constant 127 : i32
    %14 = tpu.dynamic_rotate %0 by %c127_i32 dim 1 : vector<8x128xf32>, i32 -> vector<8x128xf32>
    %15 = arith.mulf %14, %9 : vector<8x128xf32>
    %16 = arith.maximumf %13, %15 : vector<8x128xf32>
    %17 = vector.extract_strided_slice %3 {offsets = [0, 0], sizes = [8, 1], strides = [1, 1]} : vector<8x6xf32> to vector<8x1xf32>
    %18 = vector.extract_strided_slice %3 {offsets = [0, 1], sizes = [8, 1], strides = [1, 1]} : vector<8x6xf32> to vector<8x1xf32>
    %19 = vector.extract_strided_slice %3 {offsets = [0, 2], sizes = [8, 1], strides = [1, 1]} : vector<8x6xf32> to vector<8x1xf32>
    %20 = vector.extract_strided_slice %3 {offsets = [0, 3], sizes = [8, 1], strides = [1, 1]} : vector<8x6xf32> to vector<8x1xf32>
    %21 = vector.extract_strided_slice %3 {offsets = [0, 4], sizes = [8, 1], strides = [1, 1]} : vector<8x6xf32> to vector<8x1xf32>
    %22 = vector.extract_strided_slice %3 {offsets = [0, 5], sizes = [8, 1], strides = [1, 1]} : vector<8x6xf32> to vector<8x1xf32>
    %cst = arith.constant dense<0.000000e+00> : vector<8xf32>
    %23 = vector.multi_reduction <add>, %16, %cst [1] : vector<8x128xf32> to vector<8xf32>
    %24 = vector.shape_cast %23 : vector<8xf32> to vector<8x1xf32>
    %cst_7 = arith.constant 6.250000e-02 : f32
    %25 = vector.broadcast %cst_7 : f32 to vector<8x1xf32>
    %26 = arith.mulf %24, %25 : vector<8x1xf32>
    %27 = arith.mulf %16, %16 : vector<8x128xf32>
    %cst_8 = arith.constant dense<0.000000e+00> : vector<8xf32>
    %28 = vector.multi_reduction <add>, %27, %cst_8 [1] : vector<8x128xf32> to vector<8xf32>
    %29 = vector.shape_cast %28 : vector<8xf32> to vector<8x1xf32>
    %cst_9 = arith.constant 6.250000e-02 : f32
    %30 = vector.broadcast %cst_9 : f32 to vector<8x1xf32>
    %31 = arith.mulf %29, %30 : vector<8x1xf32>
    %32 = arith.mulf %26, %26 : vector<8x1xf32>
    %33 = arith.subf %31, %32 : vector<8x1xf32>
    %cst_10 = arith.constant 0.000000e+00 : f32
    %34 = vector.broadcast %cst_10 : f32 to vector<8x1xf32>
    %35 = arith.maximumf %33, %34 : vector<8x1xf32>
    %cst_11 = arith.constant 9.99999974E-6 : f32
    %36 = vector.broadcast %cst_11 : f32 to vector<8x1xf32>
    %37 = arith.addf %35, %36 : vector<8x1xf32>
    %38 = math.rsqrt %37 : vector<8x1xf32>
    %39 = arith.mulf %17, %38 : vector<8x1xf32>
    %40 = arith.mulf %26, %39 : vector<8x1xf32>
    %41 = arith.subf %18, %40 : vector<8x1xf32>
    %42 = vector.broadcast %39 : vector<8x1xf32> to vector<8x128xf32>
    %43 = arith.mulf %16, %42 : vector<8x128xf32>
    %44 = vector.broadcast %41 : vector<8x1xf32> to vector<8x128xf32>
    %45 = arith.addf %43, %44 : vector<8x128xf32>
    %cst_12 = arith.constant 0.000000e+00 : f32
    %46 = vector.broadcast %cst_12 : f32 to vector<8x128xf32>
    %47 = arith.maximumf %45, %46 : vector<8x128xf32>
    %c0_13 = arith.constant 0 : index
    %c0_14 = arith.constant 0 : index
    %48 = vector.load %arg4[%c0_13, %c0_14] : memref<8x24xbf16, #tpu.memory_space<vmem>>, vector<8x24xbf16>
    %c1_i32 = arith.constant 1 : i32
    %49 = tpu.dynamic_rotate %47 by %c1_i32 dim 1 : vector<8x128xf32>, i32 -> vector<8x128xf32>
    %50 = arith.mulf %49, %12 : vector<8x128xf32>
    %c127_i32_15 = arith.constant 127 : i32
    %51 = tpu.dynamic_rotate %47 by %c127_i32_15 dim 1 : vector<8x128xf32>, i32 -> vector<8x128xf32>
    %52 = arith.mulf %51, %9 : vector<8x128xf32>
    %53 = tpu.concatenate %50, %47, %52 in 0 : vector<8x128xf32>, vector<8x128xf32>, vector<8x128xf32> -> vector<24x128xf32>
    %54 = arith.truncf %53 : vector<24x128xf32> to vector<24x128xbf16>
    %cst_16 = arith.constant dense<0.000000e+00> : vector<8x128xf32>
    %55 = tpu.matmul %48, %54, %cst_16 {dimension_numbers = #tpu.dot_dimension_numbers<[1], [0], [0], [1], [0, 0, 1, 1], [], []>} : vector<8x24xbf16>, vector<24x128xbf16>, vector<8x128xf32> -> vector<8x128xf32>
    %56 = vector.broadcast %19 : vector<8x1xf32> to vector<8x128xf32>
    %57 = arith.addf %55, %56 : vector<8x128xf32>
    %58 = arith.mulf %57, %6 : vector<8x128xf32>
    %cst_17 = arith.constant dense<0.000000e+00> : vector<8xf32>
    %59 = vector.multi_reduction <add>, %58, %cst_17 [1] : vector<8x128xf32> to vector<8xf32>
    %60 = vector.shape_cast %59 : vector<8xf32> to vector<8x1xf32>
    %cst_18 = arith.constant 6.250000e-02 : f32
    %61 = vector.broadcast %cst_18 : f32 to vector<8x1xf32>
    %62 = arith.mulf %60, %61 : vector<8x1xf32>
    %63 = arith.mulf %58, %58 : vector<8x128xf32>
    %cst_19 = arith.constant dense<0.000000e+00> : vector<8xf32>
    %64 = vector.multi_reduction <add>, %63, %cst_19 [1] : vector<8x128xf32> to vector<8xf32>
    %65 = vector.shape_cast %64 : vector<8xf32> to vector<8x1xf32>
    %cst_20 = arith.constant 6.250000e-02 : f32
    %66 = vector.broadcast %cst_20 : f32 to vector<8x1xf32>
    %67 = arith.mulf %65, %66 : vector<8x1xf32>
    %68 = arith.mulf %62, %62 : vector<8x1xf32>
    %69 = arith.subf %67, %68 : vector<8x1xf32>
    %cst_21 = arith.constant 0.000000e+00 : f32
    %70 = vector.broadcast %cst_21 : f32 to vector<8x1xf32>
    %71 = arith.maximumf %69, %70 : vector<8x1xf32>
    %cst_22 = arith.constant 9.99999974E-6 : f32
    %72 = vector.broadcast %cst_22 : f32 to vector<8x1xf32>
    %73 = arith.addf %71, %72 : vector<8x1xf32>
    %74 = math.rsqrt %73 : vector<8x1xf32>
    %75 = arith.mulf %20, %74 : vector<8x1xf32>
    %76 = arith.mulf %62, %75 : vector<8x1xf32>
    %77 = arith.subf %21, %76 : vector<8x1xf32>
    %78 = vector.broadcast %75 : vector<8x1xf32> to vector<8x128xf32>
    %79 = arith.mulf %58, %78 : vector<8x128xf32>
    %80 = vector.broadcast %77 : vector<8x1xf32> to vector<8x128xf32>
    %81 = arith.addf %79, %80 : vector<8x128xf32>
    %cst_23 = arith.constant 0.000000e+00 : f32
    %82 = vector.broadcast %cst_23 : f32 to vector<8x128xf32>
    %83 = arith.maximumf %81, %82 : vector<8x128xf32>
    %c0_24 = arith.constant 0 : index
    %c0_25 = arith.constant 0 : index
    %84 = vector.load %arg5[%c0_24, %c0_25] : memref<8x24xbf16, #tpu.memory_space<vmem>>, vector<8x24xbf16>
    %c1_i32_26 = arith.constant 1 : i32
    %85 = tpu.dynamic_rotate %83 by %c1_i32_26 dim 1 : vector<8x128xf32>, i32 -> vector<8x128xf32>
    %86 = arith.mulf %85, %12 : vector<8x128xf32>
    %c127_i32_27 = arith.constant 127 : i32
    %87 = tpu.dynamic_rotate %83 by %c127_i32_27 dim 1 : vector<8x128xf32>, i32 -> vector<8x128xf32>
    %88 = arith.mulf %87, %9 : vector<8x128xf32>
    %89 = tpu.concatenate %86, %83, %88 in 0 : vector<8x128xf32>, vector<8x128xf32>, vector<8x128xf32> -> vector<24x128xf32>
    %90 = arith.truncf %89 : vector<24x128xf32> to vector<24x128xbf16>
    %cst_28 = arith.constant dense<0.000000e+00> : vector<8x128xf32>
    %91 = tpu.matmul %84, %90, %cst_28 {dimension_numbers = #tpu.dot_dimension_numbers<[1], [0], [0], [1], [0, 0, 1, 1], [], []>} : vector<8x24xbf16>, vector<24x128xbf16>, vector<8x128xf32> -> vector<8x128xf32>
    %92 = vector.broadcast %22 : vector<8x1xf32> to vector<8x128xf32>
    %93 = arith.addf %91, %92 : vector<8x128xf32>
    %94 = arith.mulf %93, %6 : vector<8x128xf32>
    %95 = arith.addf %94, %16 : vector<8x128xf32>
    %c0_29 = arith.constant 0 : index
    %c0_30 = arith.constant 0 : index
    %96 = vector.load %arg6[%c0_29, %c0_30] : memref<8x128xf32, #tpu.memory_space<vmem>>, vector<8x128xf32>
    tpu.vector_store %arg6[%c0_29, %c0_30], %95 {strides = array<i32>} : memref<8x128xf32, #tpu.memory_space<vmem>>, vector<8x128xf32>,
    return
  }
}

</mosaic_0001>

<bundles_post_ra>
// kernel: resnet_block.1
= control target key start
LH: loop header
LB: loop body
LE: loop exit
PB: predicated region body
PF: predicated region fallthrough
CT: control target
= control target key end

     0   :  { %s283_s23 = smov 127   ;;  %v28_v1 = vlaneseq  ;;  %v284_v12 = vmov 0   ;;  %v286_v25 = vmov 1   ;;  %v287_v28 = vmov 0.0   ;;  %s400_s0 = inlined_call_operand.vmem [shape: f32[8,128], index: 0, kind: input, shape index: {}]   ;;  %s401_s2 = inlined_call_operand.vmem [shape: f32[3,128], index: 2, kind: input, shape index: {}]   ;;  %s402_s1 = inlined_call_operand.vmem [shape: f32[8,128], index: 1, kind: input, shape index: {}]   ;;  %s403_s3 = inlined_call_operand.vmem [shape: f32[8,6], index: 3, kind: input, shape index: {}]   ;;  %s404_s4 = inlined_call_operand.vmem [shape: bf16[8,24], index: 4, kind: input, shape index: {}]   ;;  %s405_s5 = inlined_call_operand.vmem [shape: bf16[8,24], index: 5, kind: input, shape index: {}]   ;;  %s406_s6 = inlined_call_operand.vmem [shape: f32[8,128], index: 6, kind: output, shape index: {}]  }
   0x1   :  { %v24_v0 = vld [vmem:[%s400_s0] sm:$0xff]  ;;  %272 = vset.pattern.permute.xlu1 %v284_v12  ;;  %246 = vmatprep.subr.bf16.mxu0 %v287_v28  ;;  %vm288_vm0 = vmmov 0   ;;  %v289_v34 = vmov 2   ;;  %vm95_vm1 = vcmask 1043456   ;;  %vm91_vm2 = vcmask 195584  }
   0x2   :  { %41 = vrot.lane.b32.xlu0 %v24_v0, %s283_s23  ;;  %v332_v2 = vshrl.u32 %v28_v1, 7  ;;  %v338_v4 = vld [vmem:[%s401_s2] sm:$0x7]  ;;  %s285_s2 = smov 1   ;;  %254 = vmatprep.subr.bf16.mxu1 %v287_v28  ;;  %v290_v55 = vmov 3  }
   0x3   :  { %v25_v5 = vld [vmem:[%s402_s1] sm:$0xff]  ;;  %250 = vmatprep.mubr.msk.bf16.mxu0 %vm288_vm0, %v287_v28  ;;  %258 = vmatprep.mubr.msk.bf16.mxu1 %vm288_vm0, %v287_v28 }
   0x4   :  { %v34_v3 = vsub.s32 1, %v332_v2  ;;  %v40_v7 = vmax.f32 %v24_v0, %v25_v5  ;;  %v355_v21 = vld [vmem:[%s403_s3] sm:$0xff]  ;;  %274 = vset.pattern.permute.xlu0 %v289_v34  ;;  %v38_v35 = vsub.s32 2, %v332_v2  ;;  %v30_v45 = vsub.s32 0, %v332_v2 }
   0x5   :  { %v77_v44 = vld [vmem:[%s404_s4] sm:$0xf] }
   0x6   :  { %v344_v6 = vrot.slane %v338_v4, %v34_v3  ;;  %v370_v36 = vrot.slane %v338_v4, %v38_v35  ;;  %v31_v47 = vrot.slane %v338_v4, %v30_v45  ;;  %v291_v3 = vmov 4  }
  0x74   :  { %v42_v8 = vpop.permute.xlu0 %41 }
  0x75   :  { %v43_v9 = vmul.f32 %v42_v8, %v344_v6 }
  0x77   :  { %v347_v10 = vmax.f32 %v40_v7, %v43_v9 }
  0x79   :  { %45 = vadd.xlane.f32.xlu0 %v347_v10  ;;  %v48_v11 = vmul.f32 %v347_v10, %v347_v10 }
  0x7b   :  { %49 = vadd.xlane.f32.xlu1 %v48_v11 }
  0x8f   :  { %88 = vperm.xlu0 %274, %v355_v21  }
  0x93   :  { %275 = vset.pattern.permute.xlu0 %v290_v55 }
 0x106   :  { %v46_v13 = vpop.xlane.xlu0 %45 }
 0x107   :  { %v47_v14 = vmul.f32 0.0625, %v46_v13  ;;  %v292_v13 = vmov 5  }
 0x108   :  { %v50_v15 = vpop.xlane.xlu1 %49 }
 0x109   :  { %v52_v16 = vmul.f32 %v47_v14, %v47_v14  ;;  %v51_v17 = vmul.f32 0.0625, %v50_v15 }
 0x10b   :  { %v53_v18 = vsub.f32 %v51_v17, %v52_v16 }
 0x10d   :  { %v54_v19 = vmax.f32 %v53_v18, 0.0 }
 0x10e   :  { %v89_v46 = vpop.permute.xlu0 %88 }
 0x10f   :  { %v55_v20 = vadd.f32 1e-05, %v54_v19 }
 0x111   :  { %279 = vrsqrt.f32 %v55_v20 }
 0x11b   :  { %v280_v22 = vpop.eup %279 }
 0x11c   :  { %v57_v23 = vmul.f32 %v280_v22, %v355_v21  ;;  %v172_v22 = vld [vmem:[%s405_s5] sm:$0xf] }
 0x11e   :  { %v58_v24 = vmul.f32 %v57_v23, %v47_v14 }
 0x120   :  { %60 = vrot.lane.b32.xlu1 %v58_v24, %s285_s2 }
 0x124   :  { %66 = vperm.xlu1 %272, %v57_v23  }
 0x128   :  { %273 = vset.pattern.permute.xlu1 %v286_v25 }
 0x192   :  { %v61_v26 = vpop.permute.xlu1 %60 }
 0x193   :  { %v63_v27 = vsub.f32 %v355_v21, %v61_v26 }
 0x195   :  { %72 = vperm.xlu1 %273, %v63_v27  }
 0x199   :  { %277 = vset.pattern.permute.xlu1 %v292_v13 }
 0x1a3   :  { %v67_v29 = vpop.permute.xlu1 %66 }
 0x1a4   :  { %v69_v30 = vmul.f32 %v67_v29, %v347_v10 }
 0x214   :  { %v73_v31 = vpop.permute.xlu1 %72 }
 0x215   :  { %v75_v32 = vadd.f32 %v73_v31, %v69_v30 }
 0x217   :  { %v76_v33 = vmax.f32 %v75_v32, 0.0 }
 0x219   :  { %78 = vrot.lane.b32.xlu1 %v76_v33, %s285_s2 }
 0x21d   :  { %81 = vrot.lane.b32.xlu1 %v76_v33, %s283_s23 }
 0x28b   :  { %v79_v37 = vpop.permute.xlu1 %78 }
 0x28c   :  { %v80_v38 = vmul.f32 %v79_v37, %v370_v36 }
 0x28e   :  { %v84_v39 = vpack.c.bf16 %v76_v33, %v80_v38 }
 0x28f   :  { %v82_v40 = vpop.permute.xlu1 %81 }
 0x290   :  { %v83_v41 = vmul.f32 %v82_v40, %v344_v6  ;;  %247 = vmatpush3.bf16.msra.mxu0 %v84_v39 }
 0x291   :  { %248 = vmatprep.subr.bf16.mxu0 %v287_v28 }
 0x292   :  { %v85_v42 = vpack.c.bf16 %v83_v41, %v83_v41 }
 0x294   :  { %v97_v43 = vsel %vm95_vm1, %v85_v42, 0 }
 0x295   :  { %249 = vmatpush3.bf16.msra.mxu0 %v97_v43 }
 0x298   :  { %251 = vmatmul.mubr.msk.bf16.vlgmr.msra.gmra.mrb[0].mxu0 %vm91_vm2, %v77_v44 }
 0x36b   :  { %v133_v48 = vpop.f32.mrb[0].mxu0 }
 0x36c   :  { %v134_v49 = vadd.f32 %v133_v48, %v89_v46  ;;  %v252_v50 = vpop.f32.mrb[1].mxu0 }
 0x36d   :  { %v136_v51 = vpop.f32.mrb[2].mxu0 }
 0x36e   :  { %v139_v52 = vmul.f32 %v134_v49, %v31_v47  ;;  %v253_v53 = vpop.f32.mrb[3].mxu0 }
 0x370   :  { %140 = vadd.xlane.f32.xlu1 %v139_v52  ;;  %v143_v54 = vmul.f32 %v139_v52, %v139_v52 }
 0x374   :  { %144 = vadd.xlane.f32.xlu1 %v143_v54 }
 0x3fd   :  { %v141_v56 = vpop.xlane.xlu1 %140 }
 0x3fe   :  { %v142_v57 = vmul.f32 0.0625, %v141_v56 }
 0x400   :  { %v147_v59 = vmul.f32 %v142_v57, %v142_v57 }
 0x401   :  { %v145_v58 = vpop.xlane.xlu1 %144 }
 0x402   :  { %v146_v60 = vmul.f32 0.0625, %v145_v58 }
 0x404   :  { %v148_v61 = vsub.f32 %v146_v60, %v147_v59 }
 0x406   :  { %v149_v62 = vmax.f32 %v148_v61, 0.0 }
 0x408   :  { %v150_v63 = vadd.f32 1e-05, %v149_v62 }
 0x40a   :  { %281 = vrsqrt.f32 %v150_v63 }
 0x414   :  { %v282_v0 = vpop.eup %281 }
 0x415   :  { %v152_v1 = vmul.f32 %v282_v0, %v355_v21 }
 0x417   :  { %161 = vperm.xlu0 %275, %v152_v1   ;;  %v153_v2 = vmul.f32 %v152_v1, %v142_v57 }
 0x419   :  { %155 = vrot.lane.b32.xlu1 %v153_v2, %s285_s2 }
 0x41b   :  { %276 = vset.pattern.permute.xlu0 %v291_v3 }
 0x48b   :  { %v156_v4 = vpop.permute.xlu1 %155 }
 0x48c   :  { %v158_v5 = vsub.f32 %v355_v21, %v156_v4 }
 0x48e   :  { %167 = vperm.xlu0 %276, %v158_v5  }
 0x492   :  { %278 = vset.pattern.permute.xlu0 %v292_v13 }
 0x496   :  { %v162_v7 = vpop.permute.xlu0 %161 }
 0x497   :  { %v164_v8 = vmul.f32 %v162_v7, %v139_v52 }
 0x50d   :  { %v168_v9 = vpop.permute.xlu0 %167 }
 0x50e   :  { %v170_v11 = vadd.f32 %v168_v9, %v164_v8 }
 0x510   :  { %v171_v12 = vmax.f32 %v170_v11, 0.0 }
 0x512   :  { %176 = vrot.lane.b32.xlu0 %v171_v12, %s283_s23  ;;  %173 = vrot.lane.b32.xlu1 %v171_v12, %s285_s2 }
 0x516   :  { %182 = vperm.xlu1 %277, %v355_v21  }
 0x584   :  { %v177_v14 = vpop.permute.xlu0 %176  ;;  %v174_v15 = vpop.permute.xlu1 %173 }
 0x585   :  { %v178_v16 = vmul.f32 %v177_v14, %v344_v6  ;;  %v175_v17 = vmul.f32 %v174_v15, %v370_v36 }
 0x587   :  { %v179_v18 = vpack.c.bf16 %v171_v12, %v175_v17  ;;  %v180_v19 = vpack.c.bf16 %v178_v16, %v178_v16 }
 0x589   :  { %255 = vmatpush3.bf16.msra.mxu1 %v179_v18  ;;  %v189_v20 = vsel %vm95_vm1, %v180_v19, 0 }
 0x58a   :  { %256 = vmatprep.subr.bf16.mxu1 %v287_v28 }
 0x58d   :  { %257 = vmatpush3.bf16.msra.mxu1 %v189_v20 }
 0x590   :  { %259 = vmatmul.mubr.msk.bf16.vlgmr.msra.gmra.mrb[0].mxu1 %vm91_vm2, %v172_v22 }
 0x595   :  { %v183_v21 = vpop.permute.xlu1 %182 }
 0x663   :  { %v225_v23 = vpop.f32.mrb[0].mxu1 }
 0x664   :  { %v226_v24 = vadd.f32 %v225_v23, %v183_v21  ;;  %v260_v6 = vpop.f32.mrb[1].mxu1 }
 0x665   :  { %v228_v25 = vpop.f32.mrb[2].mxu1 }
 0x666   :  { %v231_v26 = vmul.f32 %v226_v24, %v31_v47  ;;  %v261_v27 = vpop.f32.mrb[3].mxu1 }
 0x668   :  { %v232_v29 = vadd.f32 %v231_v26, %v347_v10 }
 0x66a   :  { %233 = vst [vmem:[%s406_s6] sm:$0xff] %v232_v29 }

</bundles_post_ra>
